<compile_context>
chip_gen: v7x
topology: tpu7x:2x2x1
jax: 0.10.0
libtpu: 0.0.40
codegen_flags: <defaults>
</compile_context>

<pallas_src>
import functools

import jax
import jax.numpy as jnp
from jax import lax
from jax.experimental import pallas as pl
from jax.experimental.pallas import tpu as pltpu

D = 10   # feature dim (from the module)
C = 1    # linear_layer_2 out-dim; defined in __init__ but unused in forward


def _round_up(x, m):
    return ((x + m - 1) // m) * m


def _packed_relu_sum_kernel(x_ref, w_ref, o_ref, *,
                            tm, tiles_per_shard, np_valid, need_mask):
    # x_ref: (tm, 120)   lane-packed batch tile (12 original rows per row)
    # w_ref: (120, 120)  block-diag kron(I12, W1), PyTorch (out, in) layout
    # o_ref: (1, 1, 120) per-shard accumulator (resident across the inner axis)
    k = pl.program_id(1)

    @pl.when(k == 0)
    def _init():
        o_ref[...] = jnp.zeros_like(o_ref)

    # Contract x dim 1 against w dim 1 (== x @ W_bd.T) on the MXU, f32 acc.
    h = lax.dot_general(
        x_ref[...], w_ref[...],
        dimension_numbers=(((1,), (1,)), ((), ())),
        preferred_element_type=jnp.float32,
    )
    h = jnp.maximum(h, 0.0)                     # ReLU(linear_layer_1(x))

    if need_mask:
        # Zero the garbage rows of the (only) partial tile at the array edge.
        s = pl.program_id(0)
        row0 = (s * tiles_per_shard + k) * tm
        rows = lax.broadcasted_iota(jnp.int32, (tm, 1), 0) + row0
        h = jnp.where(rows < np_valid, h, 0.0)

    # Per-tile column partial sums, accumulated in the resident output block.
    o_ref[...] += jnp.sum(h, axis=0, keepdims=True)[None]


def custom_model_forward(x, w1, *, packed_block_rows=4096):
    """relu(sum(relu(x @ w1.T))); w1 kept in PyTorch (out, in) layout."""
    n, d_in = x.shape
    d_out, d_in2 = w1.shape
    assert d_in == d_in2
    dtype = x.dtype

    # How many logical rows fit in <=128 lanes (12 for D=10).
    p = max(1, 128 // max(d_in, d_out))
    in_lanes, out_lanes = p * d_in, p * d_out

    n_main = (n // p) * p
    np_main = n_main // p            # packed rows fed to the kernel

    # Remainder rows (< p): tiny plain-JAX term instead of a whole-array pad
    # copy of x in HBM (bias=False, so this is an exact split of the sum).
    tail_sum = jnp.float32(0.0)
    if n_main < n:
        h_tail = jnp.maximum(
            jnp.dot(x[n_main:], w1.T, preferred_element_type=jnp.float32), 0.0)
        tail_sum = jnp.sum(h_tail)

    if np_main == 0:
        # Fewer than p rows: fixed-overhead bound, no kernel needed.
        return jnp.maximum(tail_sum, 0.0)

    # Free reshape (row-major contiguous prefix) -> lane-dense packed layout.
    x_packed = x[:n_main].reshape(np_main, in_lanes)
    # Block-diagonal weight: p copies of W1 on the diagonal, (out, in) layout.
    w_bd = jnp.kron(jnp.eye(p, dtype=jnp.float32),
                    w1.astype(jnp.float32)).astype(dtype)

    # Packed tile height: multiple of 8 sublanes, never larger than the array.
    if np_main >= 8:
        tm = min(_round_up(max(packed_block_rows, 8), 8), (np_main // 8) * 8)
    else:
        tm = np_main                 # block == full array dim (allowed)
    num_tiles = pl.cdiv(np_main, tm)

    # 2-way shard for v7x megacore when it splits evenly (keeps index maps
    # purely affine); odd tile counts just run on one shard.
    n_shards = 2 if (num_tiles >= 2 and num_tiles % 2 == 0) else 1
    tiles_per_shard = num_tiles // n_shards
    need_mask = (np_main % tm) != 0

    kernel = functools.partial(
        _packed_relu_sum_kernel,
        tm=tm, tiles_per_shard=tiles_per_shard,
        np_valid=np_main, need_mask=need_mask,
    )

    flops = 2 * np_main * in_lanes * out_lanes
    bytes_accessed = (np_main * in_lanes * x_packed.dtype.itemsize
                      + out_lanes * in_lanes * w_bd.dtype.itemsize
                      + n_shards * out_lanes * 4)

    partial = pl.pallas_call(
        kernel,
        out_shape=jax.ShapeDtypeStruct((n_shards, 1, out_lanes), jnp.float32),
        grid=(n_shards, tiles_per_shard),
        in_specs=[
            pl.BlockSpec((tm, in_lanes),
                         lambda s, k: (s * tiles_per_shard + k, 0)),
            pl.BlockSpec((out_lanes, in_lanes), lambda s, k: (0, 0)),  # resident
        ],
        out_specs=pl.BlockSpec((1, 1, out_lanes), lambda s, k: (s, 0, 0)),
        compiler_params=pltpu.CompilerParams(
            dimension_semantics=("parallel", "arbitrary")),
        cost_estimate=pl.CostEstimate(flops=flops, transcendentals=0,
                                      bytes_accessed=bytes_accessed),
    )(x_packed, w_bd)

    # Tiny cross-shard/lane reduce; the outer ReLU is kept only for bit-parity
    # with the torch module (it's a no-op on a sum of non-negatives).
    return jnp.maximum(jnp.sum(partial) + tail_sum, 0.0)


if __name__ == "__main__":
    key = jax.random.PRNGKey(0)
    kx1, kx2, kx3, kx4, kw1, kw2 = jax.random.split(key, 6)

    bound1 = 1.0 / jnp.sqrt(jnp.float32(D))
    w1 = jax.random.uniform(kw1, (D, D), jnp.float32, -bound1, bound1)
    # linear_layer_2 weight exists in __init__ but is unused in forward.
    w2 = jax.random.uniform(kw2, (C, D), jnp.float32, -bound1, bound1)  # noqa: F841

    def ref_fn(xx):
        return jnp.maximum(jnp.sum(jnp.maximum(xx @ w1.T, 0.0)), 0.0)

    # 1) Two-shard + ragged-tile masking path (20 packed rows, tm=16).
    x1 = jax.random.normal(kx1, (240, D), jnp.float32)
    y1 = custom_model_forward(x1, w1)
    jax.block_until_ready(y1)
    assert jnp.allclose(y1, ref_fn(x1), rtol=2e-3, atol=1e-2), (y1, ref_fn(x1))

    # 2) Remainder rows (N % 12 != 0) handled without a whole-array pad copy.
    x2 = jax.random.normal(kx2, (1000, D), jnp.float32)
    y2 = custom_model_forward(x2, w1)
    jax.block_until_ready(y2)
    assert jnp.allclose(y2, ref_fn(x2), rtol=2e-3, atol=1e-2), (y2, ref_fn(x2))

    # 3) Single-tile, exactly-divisible path.
    x3 = jax.random.normal(kx3, (96, D), jnp.float32)
    y3 = custom_model_forward(x3, w1)
    jax.block_until_ready(y3)
    assert jnp.allclose(y3, ref_fn(x3), rtol=2e-3, atol=1e-2), (y3, ref_fn(x3))

    # 4) Tiny-input fallback (fewer than 12 rows -> pure-JAX path).
    x4 = jax.random.normal(kx4, (7, D), jnp.float32)
    y4 = custom_model_forward(x4, w1)
    jax.block_until_ready(y4)
    assert jnp.allclose(y4, ref_fn(x4), rtol=2e-3, atol=1e-2), (y4, ref_fn(x4))

    print("KERNEL_OK")
</pallas_src>

<mosaic_0001>
module attributes {stable_mosaic.version = 11 : i64} {
  func.func @_packed_relu_sum_kernel(%arg0: i32, %arg1: i32, %arg2: memref<16x120xf32, #tpu.memory_space<vmem>>, %arg3: memref<120x120xf32, #tpu.memory_space<vmem>>, %arg4: memref<1x1x120xf32, #tpu.memory_space<vmem>>) attributes {dimension_semantics = [#tpu.dimension_semantics<parallel>, #tpu.dimension_semantics<arbitrary>], iteration_bounds = array<i64: 2, 1>, scalar_prefetch = 0 : i64, scratch_operands = 0 : i64, tpu.core_type = #tpu.core_type<tc>, window_params = [{transform_indices = @transform_0, window_bounds = array<i64: 16, 120>}, {pipeline_mode = #tpu.pipeline_mode<synchronous>, transform_indices = @transform_1, window_bounds = array<i64: 120, 120>}, {transform_indices = @transform_2, window_bounds = array<i64: 1, 1, 120>}]} {
    %c0_i32 = arith.constant 0 : i32
    %0 = arith.cmpi eq, %arg1, %c0_i32 : i32
    %1 = arith.extui %0 : i1 to i32
    %c0_i32_0 = arith.constant 0 : i32
    %2 = arith.cmpi ne, %1, %c0_i32_0 : i32
    scf.if %2 {
      %cst_13 = arith.constant 0.000000e+00 : f32
      %26 = vector.broadcast %cst_13 : f32 to vector<1x1x120xf32>
      %c0_14 = arith.constant 0 : index
      %c0_15 = arith.constant 0 : index
      %c0_16 = arith.constant 0 : index
      %27 = vector.load %arg4[%c0_14, %c0_15, %c0_16] : memref<1x1x120xf32, #tpu.memory_space<vmem>>, vector<1x1x120xf32>
      tpu.vector_store %arg4[%c0_14, %c0_15, %c0_16], %26 {strides = array<i32>} : memref<1x1x120xf32, #tpu.memory_space<vmem>>, vector<1x1x120xf32>,
    } else {
    }
    %c0 = arith.constant 0 : index
    %c0_1 = arith.constant 0 : index
    %3 = vector.load %arg2[%c0, %c0_1] : memref<16x120xf32, #tpu.memory_space<vmem>>, vector<16x120xf32>
    %c0_2 = arith.constant 0 : index
    %c0_3 = arith.constant 0 : index
    %4 = vector.load %arg3[%c0_2, %c0_3] : memref<120x120xf32, #tpu.memory_space<vmem>>, vector<120x120xf32>
    %cst = arith.constant dense<0.000000e+00> : vector<16x120xf32>
    %5 = tpu.matmul %3, %4, %cst {dimension_numbers = #tpu.dot_dimension_numbers<[1], [1], [0], [0], [0, 0, 1, 0], [], []>} : vector<16x120xf32>, vector<120x120xf32>, vector<16x120xf32> -> vector<16x120xf32>
    %cst_4 = arith.constant 0.000000e+00 : f32
    %6 = vector.broadcast %cst_4 : f32 to vector<16x120xf32>
    %7 = arith.maximumf %5, %6 : vector<16x120xf32>
    %c1_i32 = arith.constant 1 : i32
    %8 = arith.muli %arg0, %c1_i32 : i32
    %9 = arith.addi %8, %arg1 : i32
    %c16_i32 = arith.constant 16 : i32
    %10 = arith.muli %9, %c16_i32 : i32
    %11 = tpu.iota {dimensions = array<i32: 0>} : vector<16x1xi32>
    %12 = vector.broadcast %10 : i32 to vector<16x1xi32>
    %13 = arith.addi %11, %12 : vector<16x1xi32>
    %c20_i32 = arith.constant 20 : i32
    %14 = vector.broadcast %c20_i32 : i32 to vector<16x1xi32>
    %15 = arith.cmpi slt, %13, %14 : vector<16x1xi32>
    %cst_5 = arith.constant 0.000000e+00 : f32
    %16 = vector.shape_cast %15 : vector<16x1xi1> to vector<16x1xi1>
    %17 = vector.broadcast %16 : vector<16x1xi1> to vector<16x120xi1>
    %18 = vector.broadcast %cst_5 : f32 to vector<16x120xf32>
    %19 = arith.select %17, %7, %18 : vector<16x120xi1>, vector<16x120xf32>
    %c0_6 = arith.constant 0 : index
    %c0_7 = arith.constant 0 : index
    %c0_8 = arith.constant 0 : index
    %20 = vector.load %arg4[%c0_6, %c0_7, %c0_8] : memref<1x1x120xf32, #tpu.memory_space<vmem>>, vector<1x1x120xf32>
    %cst_9 = arith.constant dense<0.000000e+00> : vector<120xf32>
    %21 = vector.multi_reduction <add>, %19, %cst_9 [0] : vector<16x120xf32> to vector<120xf32>
    %22 = vector.shape_cast %21 : vector<120xf32> to vector<1x120xf32>
    %23 = vector.shape_cast %22 : vector<1x120xf32> to vector<1x1x120xf32>
    %24 = arith.addf %20, %23 : vector<1x1x120xf32>
    %c0_10 = arith.constant 0 : index
    %c0_11 = arith.constant 0 : index
    %c0_12 = arith.constant 0 : index
    %25 = vector.load %arg4[%c0_10, %c0_11, %c0_12] : memref<1x1x120xf32, #tpu.memory_space<vmem>>, vector<1x1x120xf32>
    tpu.vector_store %arg4[%c0_10, %c0_11, %c0_12], %24 {strides = array<i32>} : memref<1x1x120xf32, #tpu.memory_space<vmem>>, vector<1x1x120xf32>,
    return
  }
  func.func @transform_0(%arg0: i32, %arg1: i32) -> (i32, i32) {
    %c1_i32 = arith.constant 1 : i32
    %0 = arith.muli %arg0, %c1_i32 : i32
    %1 = arith.addi %0, %arg1 : i32
    %c0_i32 = arith.constant 0 : i32
    %c0_i32_0 = arith.constant 0 : i32
    return %1, %c0_i32 : i32, i32
  }
  func.func @transform_1(%arg0: i32, %arg1: i32) -> (i32, i32) {
    %c0_i32 = arith.constant 0 : i32
    %c0_i32_0 = arith.constant 0 : i32
    %c0_i32_1 = arith.constant 0 : i32
    return %c0_i32, %c0_i32_0 : i32, i32
  }
  func.func @transform_2(%arg0: i32, %arg1: i32) -> (i32, i32, i32) {
    %c0_i32 = arith.constant 0 : i32
    %c0_i32_0 = arith.constant 0 : i32
    %c0_i32_1 = arith.constant 0 : i32
    return %arg0, %c0_i32, %c0_i32_0 : i32, i32, i32
  }
}

</mosaic_0001>

<bundles_post_ra>
// kernel: tpu_custom_call.1
= control target key start
LH: loop header
LB: loop body
LE: loop exit
PB: predicated region body
PF: predicated region fallthrough
CT: control target
= control target key end

     0   :  { %7 = vsyncpa [#allocation3], 0  ;;  %s1116_s0 = inlined_call_operand.hbm [shape: f32[20,120], index: 0, kind: input, shape index: {}]   ;;  %s1117_s1 = inlined_call_operand.hbm [shape: f32[120,120], index: 1, kind: input, shape index: {}]   ;;  %s1118_s2 = inlined_call_operand.hbm [shape: f32[2,1,120], index: 2, kind: output, shape index: {}]  }
   0x1   :  { %9 = vsyncpa [#allocation3 + $0x1], 0 }
   0x2   :  { %10 = vsyncpa [#allocation6], 0 }
   0x3   :  { %11 = vsyncpa [#allocation4], 0 }
   0x4   :  { %13 = vsyncpa [#allocation4 + $0x1], 0  ;;  %s850_s9 = smov 0   ;;  %s852_s10 = smov 0  }
   0x5   :  { %s854_s11 = smov 0   ;;  %s856_s12 = smov 0  }
   0x6   :  { %s858_s13 = smov 0   ;;  %s860_s14 = smov 0  }
   0x7 LB: > { %s482_s15 = sadd.s32 4294967295, %s825_s14   ;;  %s483_s16 = sadd.s32 4294967294, %s825_s14   ;;  %s825_s14 = sphi %s860_s14, %s19_s14   ;;  %s821_s13 = sphi %s858_s13, %s1143_s13   ;;  %s817_s12 = sphi %s856_s12, %s1142_s12   ;;  %s813_s11 = sphi %s854_s11, %s1141_s11   ;;  %s809_s10 = sphi %s852_s10, %s1140_s10   ;;  %s805_s9 = sphi %s850_s9, %s1139_s9  }
   0x8   : > { %s31_s17 = sadd.s32 1, %s821_s13  ;;  %s40_s18 = sadd.s32 1, %s813_s11 }
   0x9   : > { %p33_p0 = scmp.ge.s32.totalorder %s31_s17, 2  ;;  %p47_p1 = scmp.ne.s32.totalorder %s813_s11, %s809_s10 }
   0xa   : > { %p48_p2 = scmp.eq.s32.totalorder %s825_s14, 0  ;;  %p53_p3 = scmp.ne.s32.totalorder %s809_s10, %s805_s9 }
   0xb   : > { %s1145_s17 = smov (%p33_p0, %s31_s17), 0  ;;  %p895_p5 = scmp.eq.s32.totalorder %s482_s15, 0 }
   0xc   : > { %p891_p4 = por %p48_p2, %p47_p1  ;;  %s37_s21 = ssub.s32 %s821_s13, %s1145_s17 }
   0xd   : > { %s1125_s20 = scalar_select %p895_p5, 1, 0 }
   0xe   : > { %s1124_s19 = scalar_select %p891_p4, 1, 0 }
   0xf   : > { %p98_p6 = scmp.eq.s32.totalorder %s482_s15, 1  ;;  %p38_p7 = scmp.eq.s32.totalorder %s37_s21, 0 }
  0x10   : > { %p903_p8 = por %p895_p5, %p53_p3  ;;  %p104_p10 = scmp.eq.s32.totalorder %s483_s16, 1 }
  0x11   : > { %p907_p9 = por %p98_p6, %p47_p1  ;;  %p484_p12 = scmp.ge.s32.totalorder %s825_s14, 1 }
  0x12   : > { %s1126_s22 = scalar_select %p903_p8, 1, 0 }
  0x13   : > { %s1127_s23 = scalar_select %p907_p9, 1, 0 }
  0x14   : > { %s912_s24 = scalar_select %p38_p7, %s813_s11, %s40_s18  }
  0x15   : > { %p914_p11 = por %p104_p10, %p53_p3  ;;  %p111_p13 = scmp.lt.s32.totalorder %s825_s14, 3 }
  0x16   : > { %s827_s27 = smov [#allocation5]   ;;  %s683_s4 = scalar_lea.hbm %s1117_s1, 1920 }
  0x17   : > { %s1128_s25 = scalar_select %p914_p11, 1, 0 }
  0x18   : > { %p920_p0 = pnand %p484_p12, %p111_p13  ;;  %s123_s28 = sshll.u32 %s827_s27, 4  ;;  %s124_s28 = int_to_ptr.vmem [resolvable:$true] %s123_s28 }
  0x19   : > { %p684_p3 = scmp.ne.s32.totalorder %s1117_s1, %s683_s4  ;;  %p690_p12 = scmp.lt.u32.totalorder %s683_s4, %s1117_s1 }
  0x1a   : > { %s1129_s26 = scalar_select %p920_p0, 1, 0 }
  0x1b   : > { %p618_p1 = pneg %p920_p0 }
  0x1d   : > { %p928_p2 = pnand %p618_p1, %p895_p5 }
  0x1f   : > { %p685_p6 = pneg %p928_p2 }
  0x21   : > { %p686_p7 = pnand %p685_p6, %p684_p3 }
  0x23   : > { %p687_p10 = pneg %p686_p7 }
  0x25   : > { %p692_p13 = pnand %p690_p12, %p687_p10 }
  0x27   : > { %695 = shalt.err (!%p692_p13)
}
  0x28   : > { %s696_s15 = scalar_lea.vmem %s124_s28, 1920  ;;  %p704_p5 = scmp.lt.s32.totalorder %s124_s28, %s124_s28 }
  0x29   : > { %p697_p1 = scmp.ne.s32.totalorder %s124_s28, %s696_s15  ;;  %p705_p8 = scmp.lt.s32.totalorder %s696_s15, %s696_s15 }
  0x2b   : > { %p699_p11 = pnand %p697_p1, %p685_p6  ;;  %p706_p0 = por %p705_p8, %p704_p5 }
  0x2d   : > { %p700_p9 = pneg %p699_p11 }
  0x2f   : > { %p707_p4 = pnand %p706_p0, %p700_p9 }
  0x31   : > { %710 = shalt.err (!%p707_p4)
}
  0x32   : > { %s828_s16 = smov 128   ;;  %s829_s18 = smov 8  }
  0x33   : > { %621 = dma.hbm_to_vmem [thread:$0]  (!%p928_p2), %s1117_s1, 1920, %s124_s28, [#allocation6], %s828_s16, %s828_s16, %s829_s18  }
  0x34   : > { %p486_p3 = scmp.ge.s32.totalorder %s825_s14, 2 }
  0x35   : > { %p1131_p11 = scmp.ne.s32.totalorder (!%p486_p3), %s1124_s19, 0 }
  0x36   : > { %133 = sbr.rel (%p486_p3) target bundleno = 96 (0x60), region = 20 }
  0x3d   : > { %136 = sbr.rel (!%p1131_p11) target bundleno = 96 (0x60), region = 24  ;;  %s137_s30 = sand.u32 (%p1131_p11), 1, %s813_s11  }
  0x3e   : > { %s488_s3 = sshll.u32 (%p1131_p11), %s821_s13, 1  ;;  %s487_s4 = sshll.u32 (%p1131_p11), %s137_s30, 4 }
  0x3f   : > { %s144_s5 = ssub.s32 (%p1131_p11), 3, %s488_s3  ;;  %s958_s6 = scalar_lea.sflag (%p1131_p11), [#allocation3], %s137_s30 }
  0x40   : > { %p145_p4 = scmp.lt.s32.totalorder (%p1131_p11), %s144_s5, 2  ;;  %s141_s7 = scalar_lea.vmem (%p1131_p11), [#allocation2], %s487_s4 }
  0x44   : > { %s1147_s5 = smov (!%p145_p4, %s144_s5), 2 }
  0x45   : > { %s955_s29 = sshll.u32 %s1147_s5, 7 }
  0x46   : > { %s149_s28 = ssub.s32 256, %s955_s29 }
  0x47   : > { %150 = vsyncadd %s958_s6, %s149_s28  ;;  %p490_p5 = scmp.ne.s32.totalorder %s955_s29, 0  ;;  %s518_s19 = sshll.u32 %s821_s13, 8 }
  0x48   : > { %s966_s16 = scalar_lea.hbm %s1116_s0, %s518_s19  ;;  %s155_s18 = sshll.u32 %s141_s7, 4  ;;  %s968_s18 = int_to_ptr.vmem [resolvable:$true] %s155_s18 }
  0x49   : > { %s711_s21 = scalar_lea.hbm %s966_s16, %s955_s29  ;;  %s715_s3 = scalar_lea.hbm %s1116_s0, 384 }
  0x4a   : > { %p712_p8 = scmp.ne.s32.totalorder %s966_s16, %s711_s21  ;;  %p716_p2 = scmp.lt.u32.totalorder %s966_s16, %s1116_s0 }
  0x4b   : > { %p717_p6 = scmp.lt.u32.totalorder %s715_s3, %s711_s21  ;;  %p719_p10 = scmp.lt.u32.totalorder %s711_s21, %s966_s16 }
  0x4c   : > { %p713_p9 = pnand %p712_p8, %p490_p5 }
  0x4d   : > { %p718_p7 = por %p717_p6, %p716_p2 }
  0x4e   : > { %p714_p0 = pneg %p713_p9 }
  0x4f   : > { %p720_p12 = por %p719_p10, %p718_p7 }
  0x51   : > { %p721_p13 = pnand %p720_p12, %p714_p0 }
  0x53   : > { %724 = shalt.err (!%p721_p13)
}
  0x54   : > { %s725_s28 = scalar_lea.vmem %s968_s18, %s955_s29  ;;  %s830_s7 = smov [#allocation2]  }
  0x55   : > { %p726_p1 = scmp.ne.s32.totalorder %s968_s18, %s725_s28  ;;  %s729_s19 = sshll.u32 %s830_s7, 4  ;;  %s730_s19 = int_to_ptr.vmem [resolvable:$false] %s729_s19 }
  0x56   : > { %s731_s8 = scalar_lea.vmem %s730_s19, 512  ;;  %p732_p8 = scmp.lt.s32.totalorder %s968_s18, %s730_s19 }
  0x57   : > { %p727_p11 = pnand %p726_p1, %p490_p5  ;;  %p733_p9 = scmp.lt.s32.totalorder %s731_s8, %s725_s28 }
  0x59   : > { %p728_p4 = pneg %p727_p11  ;;  %p734_p2 = por %p733_p9, %p732_p8 }
  0x5b   : > { %p735_p6 = pnand %p734_p2, %p728_p4 }
  0x5d   : > { %738 = shalt.err (!%p735_p6)
}
  0x5e   : > { %s831_s15 = smov 128   ;;  %s832_s21 = smov 8  }
  0x5f   : > { %161 = dma.hbm_to_vmem [thread:$0]  (%p490_p5), %s966_s16, %s955_s29, %s968_s18, %s958_s6, %s831_s15, %s831_s15, %s832_s21  }
  0x60 PF: > { %p1132_p0 = scmp.ne.s32.totalorder %s1129_s26, 0 }
  0x61   : > { %s998_s27 = sand.u32 (!%p1132_p0), 1, %s809_s10   ;;  %p1133_p7 = scmp.ne.s32.totalorder (!%p1132_p0), %s1126_s22, 0 }
  0x62   : > { %167 = sbr.rel (%p1132_p0) target bundleno = 419 (0x1a3), region = 28  ;;  %s495_s30 = sshll.u32 (!%p1132_p0), %s998_s27, 4 }
  0x63   : > { %s170_s3 = scalar_lea.sflag (!%p1132_p0), [#allocation3], %s998_s27  ;;  %s1002_s4 = scalar_lea.vmem (!%p1132_p0), [#allocation2], %s495_s30 }
  0x69   : > { %792 = dma.done.wait (%p1133_p7), %s170_s3, 256  }
  0x6a   : > { %794 = vsyncadd (%p1133_p7), %s170_s3, 4294967040  ;;  %p1134_p5 = scmp.ne.s32.totalorder %s1125_s20, 0 }
  0x6c   : > { %796 = dma.done.wait (%p1134_p5), [#allocation6], 1920  }
  0x6d   : > { %798 = vsyncadd (%p1134_p5), [#allocation6], 4294965376  ;;  %vm226_vm0 = vcmask 982016   ;;  %v211_v1 = vld [vmem:[#allocation5] sm:$0xff]  ;;  %v212_v2 = vld [vmem:[#allocation5 + $0x8] sm:$0xff]  ;;  %vm207_vm2 = vcmask 974848   ;;  %v357_v26 = vlaneseq }
  0x6e   : > { %vm1014_vm1 = vmpackc.low %vm226_vm0, %vm226_vm0  ;;  %v213_v3 = vld [vmem:[#allocation5 + $0x10] sm:$0xff]  ;;  %v569_v4 = vpack.c.bf16 %v212_v2, %v211_v1  ;;  %v214_v5 = vld [vmem:[#allocation5 + $0x18] sm:$0xff]  ;;  %s1053_s20 = scalar_lea.vmem [#allocation7], %s998_s27  ;;  %v833_v25 = vmov 0.0   ;;  %s514_s22 = sshll.u32 %s817_s12, 4 }
  0x6f   : > { %v575_v6 = vpack.c.bf16 %v214_v5, %v213_v3  ;;  %v209_v7 = vld [vmem:[%s1002_s4] sm:$0xff]  ;;  %v216_v9 = vld [vmem:[#allocation5 + $0x28] sm:$0xff]  ;;  %v218_v12 = vld [vmem:[#allocation5 + $0x38] sm:$0xff]  ;;  %208 = vst.msk [vmem:[%s1053_s20] sm:$0x1] %vm207_vm2, %v833_v25  ;;  %v358_v27 = vshrl.u32 %v357_v26, 7  ;;  %v360_v29 = vstv %s514_s22  ;;  %s1065_s6 = scalar_lea.hbm %s1118_s2, %s514_s22 }
  0x70   : > { %571 = vmatprep.subr.msk.bf16.mxu0 %vm1014_vm1, %v569_v4  ;;  %v215_v8 = vld [vmem:[#allocation5 + $0x20] sm:$0xff]  ;;  %566 = vmatprep.mubr.msk.f32.mxu0 %vm226_vm0, %v209_v7  ;;  %v217_v11 = vld [vmem:[#allocation5 + $0x30] sm:$0xff]  ;;  %v220_v15 = vld [vmem:[#allocation5 + $0x48] sm:$0xff]  ;;  %s397_s12 = sshll.u32 %s1053_s20, 4  ;;  %s385_s16 = scalar_lea.sflag [#allocation4], %s998_s27  ;;  %s1067_s12 = int_to_ptr.vmem [resolvable:$true] %s397_s12 }
  0x71   : > { %574 = vmatpush3.bf16.xpose.msk.msra.mxu0 %vm1014_vm1, %v569_v4  ;;  %v581_v10 = vpack.c.bf16 %v216_v9, %v215_v8  ;;  %v587_v13 = vpack.c.bf16 %v218_v12, %v217_v11  ;;  %v219_v14 = vld [vmem:[#allocation5 + $0x40] sm:$0xff]  ;;  %v221_v17 = vld [vmem:[#allocation5 + $0x50] sm:$0xff]  ;;  %v222_v18 = vld [vmem:[#allocation5 + $0x58] sm:$0xff]  ;;  %v359_v28 = vadd.s32 8, %v358_v27  ;;  %v361_v31 = vadd.s32 %v360_v29, %v358_v27  ;;  %s739_s18 = scalar_lea.vmem %s1067_s12, 16  ;;  %p1137_p12 = scmp.ne.s32.totalorder %s1127_s23, 0 }
  0x72   : > { %577 = vmatprep.subr.msk.bf16.mxu0 %vm1014_vm1, %v575_v6  ;;  %v593_v16 = vpack.c.bf16 %v220_v15, %v219_v14  ;;  %v599_v19 = vpack.c.bf16 %v222_v18, %v221_v17  ;;  %v223_v20 = vld [vmem:[#allocation5 + $0x60] sm:$0xff]  ;;  %v224_v21 = vld [vmem:[#allocation5 + $0x68] sm:$0xff]  ;;  %v225_v23 = vld [vmem:[#allocation5 + $0x70] sm:$0xff]  ;;  %p740_p10 = scmp.ne.s32.totalorder %s1067_s12, %s739_s18  ;;  %s834_s5 = smov [#allocation7]  }
  0x73   : > { %v605_v22 = vpack.c.bf16 %v224_v21, %v223_v20  ;;  %v210_v24 = vld [vmem:[%s1002_s4 + $0x8] sm:$0xff]  ;;  %v362_v30 = vadd.s32 %v360_v29, %v359_v28  ;;  %vm363_vm4 = vcmp.lt.s32.totalorder %v361_v31, 20  ;;  %s743_s28 = sshll.u32 %s834_s5, 4  ;;  %s744_s28 = int_to_ptr.vmem [resolvable:$false] %s743_s28 }
  0x74   : > { %p741_p13 = pnand %p740_p10, %p1137_p12  ;;  %s745_s7 = scalar_lea.vmem %s744_s28, 32 }
  0x75   : > { %vm364_vm3 = vcmp.lt.s32.totalorder %v362_v30, 20  ;;  %p746_p11 = scmp.lt.s32.totalorder %s1067_s12, %s744_s28  ;;  %p747_p4 = scmp.lt.s32.totalorder %s745_s7, %s739_s18 }
  0x76   : > { %v371_v46 = vld [vmem:[%s1053_s20] sm:$0x1]  ;;  %p742_p1 = pneg %p741_p13 }
  0x77   : > { %p748_p8 = por %p747_p4, %p746_p11 }
  0x79   : > { %580 = vmatpush3.bf16.xpose.msk.msra.mxu0 %vm1014_vm1, %v575_v6  ;;  %p749_p9 = pnand %p748_p8, %p742_p1 }
  0x7a   : > { %583 = vmatprep.subr.msk.bf16.mxu0 %vm1014_vm1, %v581_v10 }
  0x81   : > { %586 = vmatpush3.bf16.xpose.msk.msra.mxu0 %vm1014_vm1, %v581_v10 }
  0x82   : > { %589 = vmatprep.subr.msk.bf16.mxu0 %vm1014_vm1, %v587_v13 }
  0x89   : > { %592 = vmatpush3.bf16.xpose.msk.msra.mxu0 %vm1014_vm1, %v587_v13 }
  0x8a   : > { %595 = vmatprep.subr.msk.bf16.mxu0 %vm1014_vm1, %v593_v16 }
  0x91   : > { %598 = vmatpush3.bf16.xpose.msk.msra.mxu0 %vm1014_vm1, %v593_v16 }
  0x92   : > { %601 = vmatprep.subr.msk.bf16.mxu0 %vm1014_vm1, %v599_v19 }
  0x99   : > { %604 = vmatpush3.bf16.xpose.msk.msra.mxu0 %vm1014_vm1, %v599_v19 }
  0x9a   : > { %607 = vmatprep.subr.msk.bf16.mxu0 %vm1014_vm1, %v605_v22 }
  0xa1   : > { %610 = vmatpush3.bf16.xpose.msk.msra.mxu0 %vm1014_vm1, %v605_v22 }
  0xa2   : > { %564 = vmatprep.subr.msk.mxu0 %vm226_vm0, %v225_v23 }
  0xa9   : > { %565 = vmatpush3.xpose.msk.msra.mxu0 %vm226_vm0, %v225_v23 }
  0xac   : > { %567 = vmatmul.mubr.msk.f32.vlgmr.msra.gmra.mrb[0].mxu0 %vm226_vm0, %v210_v24 }
 0x17f   : > { %v568_v32 = vpop.f32.mrb[0].mxu0 }
 0x180   : > { %v354_v33 = vmax.f32 %v568_v32, 0.0  ;;  %v344_v34 = vpop.f32.mrb[1].mxu0 }
 0x181   : > { %v353_v35 = vmax.f32 %v344_v34, 0.0 }
 0x182   : > { %v370_v36 = vsel %vm364_vm3, %v354_v33, 0.0 }
 0x183   : > { %v373_v37 = vsel %vm226_vm0, %v370_v36, 0.0  ;;  %v369_v38 = vsel %vm363_vm4, %v353_v35, 0.0 }
 0x184   : > { %v372_v39 = vsel %vm226_vm0, %v369_v38, 0.0 }
 0x185   : > { %v374_v40 = vadd.f32 %v373_v37, %v372_v39 }
 0x187   : > { %v375_v41 = vrot.slane %v374_v40, 4 }
 0x189   : > { %v376_v42 = vadd.f32 %v375_v41, %v374_v40 }
 0x18b   : > { %v377_v43 = vrot.slane %v376_v42, 2 }
 0x18d   : > { %v378_v44 = vadd.f32 %v377_v43, %v376_v42 }
 0x18f   : > { %v379_v45 = vrot.slane %v378_v44, 1 }
 0x191   : > { %v380_v47 = vadd.f32 %v379_v45, %v378_v44 }
 0x193   : > { %v381_v48 = vadd.f32 %v380_v47, %v371_v46 }
 0x195   : > { %383 = vst.msk [vmem:[%s1053_s20] sm:$0x1] %vm207_vm2, %v381_v48 }
 0x196   : > { %752 = shalt.err (!%p749_p9)
}
 0x197   : > { %s753_s19 = scalar_lea.hbm %s1065_s6, 16  ;;  %s757_s21 = scalar_lea.hbm %s1118_s2, 32 }
 0x198   : > { %p754_p2 = scmp.ne.s32.totalorder %s1065_s6, %s753_s19  ;;  %p758_p7 = scmp.lt.u32.totalorder %s1065_s6, %s1118_s2 }
 0x199   : > { %p759_p5 = scmp.lt.u32.totalorder %s757_s21, %s753_s19  ;;  %p761_p13 = scmp.lt.u32.totalorder %s753_s19, %s1065_s6 }
 0x19a   : > { %p755_p6 = pnand %p754_p2, %p1137_p12 }
 0x19b   : > { %p760_p10 = por %p759_p5, %p758_p7 }
 0x19c   : > { %p756_p0 = pneg %p755_p6 }
 0x19d   : > { %p762_p1 = por %p761_p13, %p760_p10 }
 0x19f   : > { %p763_p11 = pnand %p762_p1, %p756_p0 }
 0x1a1   : > { %766 = shalt.err (!%p763_p11)
}
 0x1a2   : > { %616 = dma.vmem_to_hbm [thread:$0]  (%p1137_p12), %s1067_s12, 16, %s1065_s6, %s385_s16  }
 0x1a3 PF: > { %s409_s3 = sand.u32 1, %s805_s9   ;;  %p1138_p4 = scmp.ne.s32.totalorder %s1128_s25, 0 }
 0x1a4   : > { %s410_s4 = scalar_lea.sflag [#allocation4], %s409_s3 }
 0x1a5   : > { %p623_p8 = pnand %p486_p3, %p1138_p4 }
 0x1a7   : > { %800 = dma.done.wait (!%p623_p8), %s410_s4, 16  }
 0x1a8   : > { %802 = vsyncadd (!%p623_p8), %s410_s4, 4294967280  ;;  %s19_s14 = sadd.s32 1, %s825_s14   ;;  %s1139_s9 = smov %s809_s10 }
 0x1a9   : > { %p16_p9 = scmp.ge.s32.totalorder %s19_s14, 4   ;;  %s1140_s10 = smov %s813_s11 }
 0x1aa   : > { %s1141_s11 = smov %s912_s24  ;;  %s1142_s12 = smov %s821_s13 }
 0x1ab   : > { %s1143_s13 = smov %s1145_s17  ;;  %18 = sbr.rel (!%p16_p9) target bundleno = 7 (0x7), region = 81 }
 0x1b2   :  { %414 = vsyncpa [#allocation3], 1 }
 0x1b3   :  { %416 = vsyncpa [#allocation3 + $0x1], 1 }
 0x1b4   :  { %417 = vsyncpa [#allocation6], 1 }
 0x1b5   :  { %418 = vsyncpa [#allocation4], 1 }
 0x1b6   :  { %420 = vsyncpa [#allocation4 + $0x1], 1 }

</bundles_post_ra>
